<compile_context>
chip_gen: v7x
topology: tpu7x:2x2x1
jax: 0.10.0
libtpu: 0.0.40
codegen_flags: <defaults>
</compile_context>

<pallas_src>
import jax
import jax.numpy as jnp
from jax.experimental import pallas as pl
from jax.experimental.pallas import tpu as pltpu


# ----------------------------------------------------------------------------
# In-kernel exact GELU.  erf via Abramowitz & Stegun 7.1.26 (|abs err| < 1.5e-7,
# i.e. float32-accurate) built only from exp/mul/add/where so it always lowers
# in Mosaic, matching PyTorch nn.GELU() (exact, erf-based) semantics.
# ----------------------------------------------------------------------------
def _erf(x):
    a1, a2, a3, a4, a5 = (0.254829592, -0.284496736, 1.421413741,
                          -1.453152027, 1.061405429)
    p = 0.3275911
    ax = jnp.abs(x)
    t = 1.0 / (1.0 + p * ax)
    poly = ((((a5 * t + a4) * t + a3) * t + a2) * t + a1) * t
    y = 1.0 - poly * jnp.exp(-ax * ax)
    return jnp.where(x < 0.0, -y, y)


def _gelu(x):
    return 0.5 * x * (1.0 + _erf(x * 0.7071067811865476))


# ----------------------------------------------------------------------------
# Fused kernel: conv_x + conv_g (im2col matmuls) + GELU gating + 1x1 proj.
# All operands are channels-on-sublanes / pixels-on-lanes (lane-dense).
#   cx: (Kx, TM)  im2col of x          wx: (dim, Kx)    bx: (dim, 1)
#   cg: (Kg, TM)  im2col of resized g  wg: (dim, Kg)    bg: (dim, 1)
#   wp1, wp2: (dim, dim)  proj_out split over the concat     bp: (dim, 1)
#   o : (dim, TM)
# ----------------------------------------------------------------------------
def _hfb_fused_kernel(cx_ref, cg_ref, wx_ref, bx_ref, wg_ref, bg_ref,
                      wp1_ref, wp2_ref, bp_ref, o_ref):
    cx = cx_ref[...].astype(jnp.float32)
    cg = cg_ref[...].astype(jnp.float32)
    x1 = (jnp.dot(wx_ref[...].astype(jnp.float32), cx,
                  preferred_element_type=jnp.float32)
          + bx_ref[...].astype(jnp.float32))                      # (dim, TM)
    x2 = (jnp.dot(wg_ref[...].astype(jnp.float32), cg,
                  preferred_element_type=jnp.float32)
          + bg_ref[...].astype(jnp.float32))                      # (dim, TM)
    a = x1 * _gelu(x2)
    b = x2 * _gelu(x1)
    y = (jnp.dot(wp1_ref[...].astype(jnp.float32), a,
                 preferred_element_type=jnp.float32)
         + jnp.dot(wp2_ref[...].astype(jnp.float32), b,
                   preferred_element_type=jnp.float32)
         + bp_ref[...].astype(jnp.float32))                       # (dim, TM)
    o_ref[...] = y.astype(o_ref.dtype)


def _pick_m_tile(M):
    # Lane-dense tiles (multiple of 128); prefer >=2 grid steps so both v7x
    # TensorCores get work, and keep per-step VMEM bounded for large frames.
    for t in (1024, 512, 256, 128):
        if M % t == 0 and M // t >= 2:
            return t
    return M


def hfb_fused_call(cols_x, cols_g, wx, bx, wg, bg, wp1, wp2, bp, out_dtype):
    Kx, M = cols_x.shape
    Kg = cols_g.shape[0]
    dim = wx.shape[0]
    TM = _pick_m_tile(M)
    grid = (M // TM,)
    return pl.pallas_call(
        _hfb_fused_kernel,
        out_shape=jax.ShapeDtypeStruct((dim, M), out_dtype),
        grid_spec=pltpu.PrefetchScalarGridSpec(
            num_scalar_prefetch=0,
            grid=grid,
            in_specs=[
                pl.BlockSpec((Kx, TM), lambda i: (0, i)),
                pl.BlockSpec((Kg, TM), lambda i: (0, i)),
                pl.BlockSpec((dim, Kx), lambda i: (0, 0)),
                pl.BlockSpec((dim, 1), lambda i: (0, 0)),
                pl.BlockSpec((dim, Kg), lambda i: (0, 0)),
                pl.BlockSpec((dim, 1), lambda i: (0, 0)),
                pl.BlockSpec((dim, dim), lambda i: (0, 0)),
                pl.BlockSpec((dim, dim), lambda i: (0, 0)),
                pl.BlockSpec((dim, 1), lambda i: (0, 0)),
            ],
            out_specs=pl.BlockSpec((dim, TM), lambda i: (0, i)),
        ),
        compiler_params=pltpu.CompilerParams(
            dimension_semantics=("parallel",)),
    )(cols_x, cols_g, wx, bx, wg, bg, wp1, wp2, bp)


# ----------------------------------------------------------------------------
# Layout glue (pure JAX): im2col in transposed layout + weight repacking.
# ----------------------------------------------------------------------------
def _im2col_T(x_nchw):
    """3x3 / stride 1 / pad 1 im2col, transposed: (B,C,H,W) -> (9*C, B*H*W).
    Row index = (dy*3+dx)*C + c ; column index = b*H*W + h*W + w."""
    B, C, H, W = x_nchw.shape
    xp = jnp.pad(x_nchw, ((0, 0), (0, 0), (1, 1), (1, 1)))
    taps = [xp[:, :, dy:dy + H, dx:dx + W] for dy in range(3) for dx in range(3)]
    cols = jnp.stack(taps, axis=0)                 # (9, B, C, H, W)
    cols = cols.transpose(0, 2, 1, 3, 4)           # (9, C, B, H, W)
    return cols.reshape(9 * C, B * H * W)


def _conv3x3_w_T(w_oihw):
    """(Cout, Cin, 3, 3) -> (Cout, 9*Cin), matching _im2col_T's row order."""
    Cout, Cin = w_oihw.shape[:2]
    return jnp.transpose(w_oihw, (0, 2, 3, 1)).reshape(Cout, 9 * Cin)


def _pad_rows(a, mult=8):
    pad = (-a.shape[0]) % mult
    return a if pad == 0 else jnp.pad(a, ((0, pad),) + ((0, 0),) * (a.ndim - 1))


def _pad_cols(a, mult=8):
    pad = (-a.shape[1]) % mult
    return a if pad == 0 else jnp.pad(a, ((0, 0), (0, pad)))


# ----------------------------------------------------------------------------
# Full HFB forward (NCHW in / NCHW out, matching the PyTorch module).
# ----------------------------------------------------------------------------
def hfb_forward(params, x_nchw, g_nchw):
    B, dim, H, W = x_nchw.shape
    g_dim = g_nchw.shape[1]

    # Bilinear resize of g to (H, W) — half-pixel centers == PyTorch
    # F.interpolate(mode='bilinear', align_corners=False).  Gather-based; glue.
    g_res = jax.image.resize(g_nchw, (B, g_dim, H, W), method='linear',
                             antialias=False)

    # im2col layout prep (XLA glue) in the transposed, lane-dense layout.
    cols_x = _pad_rows(_im2col_T(x_nchw), 8)       # (9*dim,          B*H*W)
    cols_g = _pad_rows(_im2col_T(g_res), 8)        # (pad8(9*g_dim),  B*H*W)

    wx = _pad_cols(_conv3x3_w_T(params['wx']), 8)  # (dim, 9*dim)
    wg = _pad_cols(_conv3x3_w_T(params['wg']), 8)  # (dim, pad8(9*g_dim))
    wp = params['wp'][:, :, 0, 0]                  # (dim, 2*dim)
    wp1, wp2 = wp[:, :dim], wp[:, dim:]
    bx = params['bx'].reshape(dim, 1)
    bg = params['bg'].reshape(dim, 1)
    bp = params['bp'].reshape(dim, 1)

    y_t = hfb_fused_call(cols_x, cols_g, wx, bx, wg, bg, wp1, wp2, bp,
                         x_nchw.dtype)             # (dim, B*H*W), lane-dense
    return y_t.reshape(dim, B, H, W).transpose(1, 0, 2, 3)


# ----------------------------------------------------------------------------
# Parameters (deterministic, PyTorch Conv2d-style uniform init).
# ----------------------------------------------------------------------------
def init_params(key, dim=16, g_dim=6):
    ks = jax.random.split(key, 6)

    def conv_init(kw, kb, fan_in, w_shape, b_shape):
        bound = 1.0 / float(fan_in) ** 0.5
        w = jax.random.uniform(kw, w_shape, jnp.float32, -bound, bound)
        b = jax.random.uniform(kb, b_shape, jnp.float32, -bound, bound)
        return w, b

    p = {}
    p['wx'], p['bx'] = conv_init(ks[0], ks[1], dim * 9, (dim, dim, 3, 3), (dim,))
    p['wg'], p['bg'] = conv_init(ks[2], ks[3], g_dim * 9, (dim, g_dim, 3, 3), (dim,))
    p['wp'], p['bp'] = conv_init(ks[4], ks[5], 2 * dim, (dim, 2 * dim, 1, 1), (dim,))
    return p


# ----------------------------------------------------------------------------
# Pure-JAX/XLA reference of the same module (for an in-script sanity check).
# ----------------------------------------------------------------------------
def reference_forward(params, x_nchw, g_nchw):
    B, dim, H, W = x_nchw.shape
    g_dim = g_nchw.shape[1]
    g_res = jax.image.resize(g_nchw, (B, g_dim, H, W), method='linear',
                             antialias=False)

    def conv(inp, w):
        return jax.lax.conv_general_dilated(
            inp, w, window_strides=(1, 1), padding=((1, 1), (1, 1)),
            dimension_numbers=('NCHW', 'OIHW', 'NCHW'))

    x1 = conv(x_nchw, params['wx']) + params['bx'].reshape(1, dim, 1, 1)
    x2 = conv(g_res, params['wg']) + params['bg'].reshape(1, dim, 1, 1)
    gel = lambda t: jax.nn.gelu(t, approximate=False)
    cat = jnp.concatenate([x1 * gel(x2), x2 * gel(x1)], axis=1)
    wp = params['wp'][:, :, 0, 0]
    return jnp.einsum('oc,bchw->bohw', wp, cat) + params['bp'].reshape(1, dim, 1, 1)


if __name__ == "__main__":
    key = jax.random.PRNGKey(0)
    kp, kx, kg = jax.random.split(key, 3)
    dim, g_dim = 16, 6
    B, H, W = 2, 16, 16

    params = init_params(kp, dim=dim, g_dim=g_dim)
    x = jax.random.normal(kx, (B, dim, H, W), jnp.float32)
    g = jax.random.normal(kg, (B, g_dim, H // 2, W // 2), jnp.float32)

    fwd = jax.jit(hfb_forward)
    y = jax.block_until_ready(fwd(params, x, g))
    assert y.shape == (B, dim, H, W), y.shape
    assert bool(jnp.all(jnp.isfinite(y)))

    # Sanity check against the XLA reference (loose tolerance to cover MXU
    # pass precision differences; a layout/weight-mapping bug would be O(1)).
    y_ref = jax.block_until_ready(reference_forward(params, x, g))
    err = float(jnp.max(jnp.abs(y - y_ref)))
    scale = float(jnp.max(jnp.abs(y_ref)))
    assert err <= 1e-1 * max(1.0, scale), (err, scale)

    print("KERNEL_OK")
</pallas_src>

<mosaic_0001>
module attributes {stable_mosaic.version = 11 : i64} {
  func.func @_hfb_fused_kernel(%arg0: i32, %arg1: memref<144x256xf32, #tpu.memory_space<vmem>>, %arg2: memref<56x256xf32, #tpu.memory_space<vmem>>, %arg3: memref<16x144xf32, #tpu.memory_space<vmem>>, %arg4: memref<16x1xf32, #tpu.memory_space<vmem>>, %arg5: memref<16x56xf32, #tpu.memory_space<vmem>>, %arg6: memref<16x1xf32, #tpu.memory_space<vmem>>, %arg7: memref<16x16xf32, #tpu.memory_space<vmem>>, %arg8: memref<16x16xf32, #tpu.memory_space<vmem>>, %arg9: memref<16x1xf32, #tpu.memory_space<vmem>>, %arg10: memref<16x256xf32, #tpu.memory_space<vmem>>) attributes {dimension_semantics = [#tpu.dimension_semantics<parallel>], iteration_bounds = array<i64: 2>, scalar_prefetch = 0 : i64, scratch_operands = 0 : i64, tpu.core_type = #tpu.core_type<tc>, window_params = [{transform_indices = @transform_0, window_bounds = array<i64: 144, 256>}, {transform_indices = @transform_1, window_bounds = array<i64: 56, 256>}, {pipeline_mode = #tpu.pipeline_mode<synchronous>, transform_indices = @transform_2, window_bounds = array<i64: 16, 144>}, {pipeline_mode = #tpu.pipeline_mode<synchronous>, transform_indices = @transform_3, window_bounds = array<i64: 16, 1>}, {pipeline_mode = #tpu.pipeline_mode<synchronous>, transform_indices = @transform_4, window_bounds = array<i64: 16, 56>}, {pipeline_mode = #tpu.pipeline_mode<synchronous>, transform_indices = @transform_5, window_bounds = array<i64: 16, 1>}, {pipeline_mode = #tpu.pipeline_mode<synchronous>, transform_indices = @transform_6, window_bounds = array<i64: 16, 16>}, {pipeline_mode = #tpu.pipeline_mode<synchronous>, transform_indices = @transform_7, window_bounds = array<i64: 16, 16>}, {pipeline_mode = #tpu.pipeline_mode<synchronous>, transform_indices = @transform_8, window_bounds = array<i64: 16, 1>}, {transform_indices = @transform_9, window_bounds = array<i64: 16, 256>}]} {
    %c0 = arith.constant 0 : index
    %c0_0 = arith.constant 0 : index
    %0 = vector.load %arg1[%c0, %c0_0] : memref<144x256xf32, #tpu.memory_space<vmem>>, vector<144x256xf32>
    %c0_1 = arith.constant 0 : index
    %c0_2 = arith.constant 0 : index
    %1 = vector.load %arg2[%c0_1, %c0_2] : memref<56x256xf32, #tpu.memory_space<vmem>>, vector<56x256xf32>
    %c0_3 = arith.constant 0 : index
    %c0_4 = arith.constant 0 : index
    %2 = vector.load %arg3[%c0_3, %c0_4] : memref<16x144xf32, #tpu.memory_space<vmem>>, vector<16x144xf32>
    %cst = arith.constant dense<0.000000e+00> : vector<16x256xf32>
    %3 = tpu.matmul %2, %0, %cst {dimension_numbers = #tpu.dot_dimension_numbers<[1], [0], [0], [1], [0, 0, 1, 1], [], []>} : vector<16x144xf32>, vector<144x256xf32>, vector<16x256xf32> -> vector<16x256xf32>
    %c0_5 = arith.constant 0 : index
    %c0_6 = arith.constant 0 : index
    %4 = vector.load %arg4[%c0_5, %c0_6] : memref<16x1xf32, #tpu.memory_space<vmem>>, vector<16x1xf32>
    %5 = vector.broadcast %4 : vector<16x1xf32> to vector<16x256xf32>
    %6 = arith.addf %3, %5 : vector<16x256xf32>
    %c0_7 = arith.constant 0 : index
    %c0_8 = arith.constant 0 : index
    %7 = vector.load %arg5[%c0_7, %c0_8] : memref<16x56xf32, #tpu.memory_space<vmem>>, vector<16x56xf32>
    %cst_9 = arith.constant dense<0.000000e+00> : vector<16x256xf32>
    %8 = tpu.matmul %7, %1, %cst_9 {dimension_numbers = #tpu.dot_dimension_numbers<[1], [0], [0], [1], [0, 0, 1, 1], [], []>} : vector<16x56xf32>, vector<56x256xf32>, vector<16x256xf32> -> vector<16x256xf32>
    %c0_10 = arith.constant 0 : index
    %c0_11 = arith.constant 0 : index
    %9 = vector.load %arg6[%c0_10, %c0_11] : memref<16x1xf32, #tpu.memory_space<vmem>>, vector<16x1xf32>
    %10 = vector.broadcast %9 : vector<16x1xf32> to vector<16x256xf32>
    %11 = arith.addf %8, %10 : vector<16x256xf32>
    %cst_12 = arith.constant 5.000000e-01 : f32
    %12 = vector.broadcast %cst_12 : f32 to vector<16x256xf32>
    %13 = arith.mulf %12, %11 : vector<16x256xf32>
    %cst_13 = arith.constant 0.707106769 : f32
    %14 = vector.broadcast %cst_13 : f32 to vector<16x256xf32>
    %15 = arith.mulf %11, %14 : vector<16x256xf32>
    %16 = math.absf %15 : vector<16x256xf32>
    %cst_14 = arith.constant 0.327591091 : f32
    %17 = vector.broadcast %cst_14 : f32 to vector<16x256xf32>
    %18 = arith.mulf %17, %16 : vector<16x256xf32>
    %cst_15 = arith.constant 1.000000e+00 : f32
    %19 = vector.broadcast %cst_15 : f32 to vector<16x256xf32>
    %20 = arith.addf %19, %18 : vector<16x256xf32>
    %cst_16 = arith.constant 1.000000e+00 : f32
    %21 = vector.broadcast %cst_16 : f32 to vector<16x256xf32>
    %22 = arith.divf %21, %20 : vector<16x256xf32>
    %cst_17 = arith.constant 1.06140542 : f32
    %23 = vector.broadcast %cst_17 : f32 to vector<16x256xf32>
    %24 = arith.mulf %23, %22 : vector<16x256xf32>
    %cst_18 = arith.constant -1.45315206 : f32
    %25 = vector.broadcast %cst_18 : f32 to vector<16x256xf32>
    %26 = arith.addf %24, %25 : vector<16x256xf32>
    %27 = arith.mulf %26, %22 : vector<16x256xf32>
    %cst_19 = arith.constant 1.42141378 : f32
    %28 = vector.broadcast %cst_19 : f32 to vector<16x256xf32>
    %29 = arith.addf %27, %28 : vector<16x256xf32>
    %30 = arith.mulf %29, %22 : vector<16x256xf32>
    %cst_20 = arith.constant -0.284496725 : f32
    %31 = vector.broadcast %cst_20 : f32 to vector<16x256xf32>
    %32 = arith.addf %30, %31 : vector<16x256xf32>
    %33 = arith.mulf %32, %22 : vector<16x256xf32>
    %cst_21 = arith.constant 0.254829586 : f32
    %34 = vector.broadcast %cst_21 : f32 to vector<16x256xf32>
    %35 = arith.addf %33, %34 : vector<16x256xf32>
    %36 = arith.mulf %35, %22 : vector<16x256xf32>
    %cst_22 = arith.constant 0.000000e+00 : f32
    %37 = vector.broadcast %cst_22 : f32 to vector<16x256xf32>
    %38 = arith.subf %37, %16 : vector<16x256xf32>
    %39 = arith.mulf %38, %16 : vector<16x256xf32>
    %40 = math.exp %39 : vector<16x256xf32>
    %41 = arith.mulf %36, %40 : vector<16x256xf32>
    %cst_23 = arith.constant 1.000000e+00 : f32
    %42 = vector.broadcast %cst_23 : f32 to vector<16x256xf32>
    %43 = arith.subf %42, %41 : vector<16x256xf32>
    %cst_24 = arith.constant 0.000000e+00 : f32
    %44 = vector.broadcast %cst_24 : f32 to vector<16x256xf32>
    %45 = arith.cmpf olt, %15, %44 : vector<16x256xf32>
    %cst_25 = arith.constant 0.000000e+00 : f32
    %46 = vector.broadcast %cst_25 : f32 to vector<16x256xf32>
    %47 = arith.subf %46, %43 : vector<16x256xf32>
    %48 = arith.select %45, %47, %43 : vector<16x256xi1>, vector<16x256xf32>
    %cst_26 = arith.constant 1.000000e+00 : f32
    %49 = vector.broadcast %cst_26 : f32 to vector<16x256xf32>
    %50 = arith.addf %49, %48 : vector<16x256xf32>
    %51 = arith.mulf %13, %50 : vector<16x256xf32>
    %52 = arith.mulf %6, %51 : vector<16x256xf32>
    %cst_27 = arith.constant 5.000000e-01 : f32
    %53 = vector.broadcast %cst_27 : f32 to vector<16x256xf32>
    %54 = arith.mulf %53, %6 : vector<16x256xf32>
    %cst_28 = arith.constant 0.707106769 : f32
    %55 = vector.broadcast %cst_28 : f32 to vector<16x256xf32>
    %56 = arith.mulf %6, %55 : vector<16x256xf32>
    %57 = math.absf %56 : vector<16x256xf32>
    %cst_29 = arith.constant 0.327591091 : f32
    %58 = vector.broadcast %cst_29 : f32 to vector<16x256xf32>
    %59 = arith.mulf %58, %57 : vector<16x256xf32>
    %cst_30 = arith.constant 1.000000e+00 : f32
    %60 = vector.broadcast %cst_30 : f32 to vector<16x256xf32>
    %61 = arith.addf %60, %59 : vector<16x256xf32>
    %cst_31 = arith.constant 1.000000e+00 : f32
    %62 = vector.broadcast %cst_31 : f32 to vector<16x256xf32>
    %63 = arith.divf %62, %61 : vector<16x256xf32>
    %cst_32 = arith.constant 1.06140542 : f32
    %64 = vector.broadcast %cst_32 : f32 to vector<16x256xf32>
    %65 = arith.mulf %64, %63 : vector<16x256xf32>
    %cst_33 = arith.constant -1.45315206 : f32
    %66 = vector.broadcast %cst_33 : f32 to vector<16x256xf32>
    %67 = arith.addf %65, %66 : vector<16x256xf32>
    %68 = arith.mulf %67, %63 : vector<16x256xf32>
    %cst_34 = arith.constant 1.42141378 : f32
    %69 = vector.broadcast %cst_34 : f32 to vector<16x256xf32>
    %70 = arith.addf %68, %69 : vector<16x256xf32>
    %71 = arith.mulf %70, %63 : vector<16x256xf32>
    %cst_35 = arith.constant -0.284496725 : f32
    %72 = vector.broadcast %cst_35 : f32 to vector<16x256xf32>
    %73 = arith.addf %71, %72 : vector<16x256xf32>
    %74 = arith.mulf %73, %63 : vector<16x256xf32>
    %cst_36 = arith.constant 0.254829586 : f32
    %75 = vector.broadcast %cst_36 : f32 to vector<16x256xf32>
    %76 = arith.addf %74, %75 : vector<16x256xf32>
    %77 = arith.mulf %76, %63 : vector<16x256xf32>
    %cst_37 = arith.constant 0.000000e+00 : f32
    %78 = vector.broadcast %cst_37 : f32 to vector<16x256xf32>
    %79 = arith.subf %78, %57 : vector<16x256xf32>
    %80 = arith.mulf %79, %57 : vector<16x256xf32>
    %81 = math.exp %80 : vector<16x256xf32>
    %82 = arith.mulf %77, %81 : vector<16x256xf32>
    %cst_38 = arith.constant 1.000000e+00 : f32
    %83 = vector.broadcast %cst_38 : f32 to vector<16x256xf32>
    %84 = arith.subf %83, %82 : vector<16x256xf32>
    %cst_39 = arith.constant 0.000000e+00 : f32
    %85 = vector.broadcast %cst_39 : f32 to vector<16x256xf32>
    %86 = arith.cmpf olt, %56, %85 : vector<16x256xf32>
    %cst_40 = arith.constant 0.000000e+00 : f32
    %87 = vector.broadcast %cst_40 : f32 to vector<16x256xf32>
    %88 = arith.subf %87, %84 : vector<16x256xf32>
    %89 = arith.select %86, %88, %84 : vector<16x256xi1>, vector<16x256xf32>
    %cst_41 = arith.constant 1.000000e+00 : f32
    %90 = vector.broadcast %cst_41 : f32 to vector<16x256xf32>
    %91 = arith.addf %90, %89 : vector<16x256xf32>
    %92 = arith.mulf %54, %91 : vector<16x256xf32>
    %93 = arith.mulf %11, %92 : vector<16x256xf32>
    %c0_42 = arith.constant 0 : index
    %c0_43 = arith.constant 0 : index
    %94 = vector.load %arg7[%c0_42, %c0_43] : memref<16x16xf32, #tpu.memory_space<vmem>>, vector<16x16xf32>
    %cst_44 = arith.constant dense<0.000000e+00> : vector<16x256xf32>
    %95 = tpu.matmul %94, %52, %cst_44 {dimension_numbers = #tpu.dot_dimension_numbers<[1], [0], [0], [1], [0, 0, 1, 1], [], []>} : vector<16x16xf32>, vector<16x256xf32>, vector<16x256xf32> -> vector<16x256xf32>
    %c0_45 = arith.constant 0 : index
    %c0_46 = arith.constant 0 : index
    %96 = vector.load %arg8[%c0_45, %c0_46] : memref<16x16xf32, #tpu.memory_space<vmem>>, vector<16x16xf32>
    %cst_47 = arith.constant dense<0.000000e+00> : vector<16x256xf32>
    %97 = tpu.matmul %96, %93, %cst_47 {dimension_numbers = #tpu.dot_dimension_numbers<[1], [0], [0], [1], [0, 0, 1, 1], [], []>} : vector<16x16xf32>, vector<16x256xf32>, vector<16x256xf32> -> vector<16x256xf32>
    %98 = arith.addf %95, %97 : vector<16x256xf32>
    %c0_48 = arith.constant 0 : index
    %c0_49 = arith.constant 0 : index
    %99 = vector.load %arg9[%c0_48, %c0_49] : memref<16x1xf32, #tpu.memory_space<vmem>>, vector<16x1xf32>
    %100 = vector.broadcast %99 : vector<16x1xf32> to vector<16x256xf32>
    %101 = arith.addf %98, %100 : vector<16x256xf32>
    %c0_50 = arith.constant 0 : index
    %c0_51 = arith.constant 0 : index
    %102 = vector.load %arg10[%c0_50, %c0_51] : memref<16x256xf32, #tpu.memory_space<vmem>>, vector<16x256xf32>
    tpu.vector_store %arg10[%c0_50, %c0_51], %101 {strides = array<i32>} : memref<16x256xf32, #tpu.memory_space<vmem>>, vector<16x256xf32>,
    return
  }
  func.func @transform_0(%arg0: i32) -> (i32, i32) {
    %c0_i32 = arith.constant 0 : i32
    %c0_i32_0 = arith.constant 0 : i32
    return %c0_i32, %arg0 : i32, i32
  }
  func.func @transform_1(%arg0: i32) -> (i32, i32) {
    %c0_i32 = arith.constant 0 : i32
    %c0_i32_0 = arith.constant 0 : i32
    return %c0_i32, %arg0 : i32, i32
  }
  func.func @transform_2(%arg0: i32) -> (i32, i32) {
    %c0_i32 = arith.constant 0 : i32
    %c0_i32_0 = arith.constant 0 : i32
    %c0_i32_1 = arith.constant 0 : i32
    return %c0_i32, %c0_i32_0 : i32, i32
  }
  func.func @transform_3(%arg0: i32) -> (i32, i32) {
    %c0_i32 = arith.constant 0 : i32
    %c0_i32_0 = arith.constant 0 : i32
    %c0_i32_1 = arith.constant 0 : i32
    return %c0_i32, %c0_i32_0 : i32, i32
  }
  func.func @transform_4(%arg0: i32) -> (i32, i32) {
    %c0_i32 = arith.constant 0 : i32
    %c0_i32_0 = arith.constant 0 : i32
    %c0_i32_1 = arith.constant 0 : i32
    return %c0_i32, %c0_i32_0 : i32, i32
  }
  func.func @transform_5(%arg0: i32) -> (i32, i32) {
    %c0_i32 = arith.constant 0 : i32
    %c0_i32_0 = arith.constant 0 : i32
    %c0_i32_1 = arith.constant 0 : i32
    return %c0_i32, %c0_i32_0 : i32, i32
  }
  func.func @transform_6(%arg0: i32) -> (i32, i32) {
    %c0_i32 = arith.constant 0 : i32
    %c0_i32_0 = arith.constant 0 : i32
    %c0_i32_1 = arith.constant 0 : i32
    return %c0_i32, %c0_i32_0 : i32, i32
  }
  func.func @transform_7(%arg0: i32) -> (i32, i32) {
    %c0_i32 = arith.constant 0 : i32
    %c0_i32_0 = arith.constant 0 : i32
    %c0_i32_1 = arith.constant 0 : i32
    return %c0_i32, %c0_i32_0 : i32, i32
  }
  func.func @transform_8(%arg0: i32) -> (i32, i32) {
    %c0_i32 = arith.constant 0 : i32
    %c0_i32_0 = arith.constant 0 : i32
    %c0_i32_1 = arith.constant 0 : i32
    return %c0_i32, %c0_i32_0 : i32, i32
  }
  func.func @transform_9(%arg0: i32) -> (i32, i32) {
    %c0_i32 = arith.constant 0 : i32
    %c0_i32_0 = arith.constant 0 : i32
    return %c0_i32, %arg0 : i32, i32
  }
}

</mosaic_0001>

<bundles_post_ra>
// kernel: hfb_forward.1
= control target key start
LH: loop header
LB: loop body
LE: loop exit
PB: predicated region body
PF: predicated region fallthrough
CT: control target
= control target key end

     0   :  { %s1481_s30 = smov 0   ;;  %s1483_s10 = smov 0   ;;  %s1906_s0 = inlined_call_operand.vmem [shape: f32[144,512], index: 0, kind: input, shape index: {}]   ;;  %s1907_s1 = inlined_call_operand.vmem [shape: f32[56,512], index: 1, kind: input, shape index: {}]   ;;  %s1908_s2 = inlined_call_operand.vmem [shape: f32[16,144], index: 2, kind: input, shape index: {}]   ;;  %s1909_s3 = inlined_call_operand.vmem [shape: f32[16,1], index: 3, kind: input, shape index: {}]   ;;  %s1910_s4 = inlined_call_operand.vmem [shape: f32[16,56], index: 4, kind: input, shape index: {}]   ;;  %s1911_s5 = inlined_call_operand.vmem [shape: f32[16,1], index: 5, kind: input, shape index: {}]   ;;  %s1912_s6 = inlined_call_operand.vmem [shape: f32[16,16], index: 6, kind: input, shape index: {}]   ;;  %s1913_s7 = inlined_call_operand.vmem [shape: f32[16,16], index: 7, kind: input, shape index: {}]   ;;  %s1914_s8 = inlined_call_operand.vmem [shape: f32[16,1], index: 8, kind: input, shape index: {}]   ;;  %s1915_s9 = inlined_call_operand.vmem [shape: f32[16,512], index: 9, kind: output, shape index: {}]  }
   0x1   :  { %s1485_s11 = smov 0  }
   0x2 LB: > { %s1255_s12 = sadd.s32 4294967295, %s1427_s11   ;;  %s1498_s13 = sadd.s32 1, %s1427_s11   ;;  %s1427_s11 = sphi %s1485_s11, %s1920_s11   ;;  %s1423_s10 = sphi %s1483_s10, %s1919_s10   ;;  %s1419_s30 = sphi %s1481_s30, %s1918_s30  }
   0x3   : > { %s23_s14 = ssub.s32 %s1427_s11, %s1498_s13  ;;  %s26_s15 = sadd.s32 1, %s1423_s10 }
   0x4   : > { %p24_p0 = scmp.eq.s32.totalorder %s23_s14, 0  ;;  %p33_p1 = scmp.ne.s32.totalorder %s1423_s10, %s1419_s30 }
   0x5   : > { %p34_p2 = scmp.eq.s32.totalorder %s1427_s11, 0  ;;  %p236_p3 = scmp.eq.s32.totalorder %s1255_s12, 1 }
   0x6   : > { %s1509_s16 = scalar_select %p24_p0, %s1423_s10, %s26_s15  }
   0x7   : > { %p1511_p4 = por %p34_p2, %p33_p1  ;;  %p1515_p5 = por %p236_p3, %p33_p1 }
   0x8   : > { %p1258_p6 = scmp.ge.s32.totalorder %s1427_s11, 2 }
   0xa   : > { %279 = sbr.rel (%p1258_p6) target bundleno = 50 (0x32), region = 44 }
  0x11   : > { %282 = sbr.rel (!%p1511_p4) target bundleno = 39 (0x27), region = 48  ;;  %s284_s19 = sand.u32 (%p1511_p4), 1, %s1423_s10  }
  0x12   : > { %s1278_s20 = sshll.u32 (%p1511_p4), %s1427_s11, 4  ;;  %s1341_s21 = smul.u32 (%p1511_p4), 288, %s284_s19 }
  0x13   : > { %s1527_s24 = scalar_lea.vmem (%p1511_p4), %s1906_s0, %s1278_s20 }
  0x14   : > { %v302_v0 = vld [vmem:[%s1527_s24] sm:$0xff] (%p1511_p4)  ;;  %v304_v1 = vld [vmem:[%s1527_s24 + $0x8] sm:$0xff] (%p1511_p4)  ;;  %s1535_s25 = scalar_lea.vmem (%p1511_p4), [#allocation2], %s1341_s21 }
  0x15   : > { %v306_v2 = vld [vmem:[%s1527_s24 + $0x20] sm:$0xff] (%p1511_p4)  ;;  %v308_v3 = vld [vmem:[%s1527_s24 + $0x28] sm:$0xff] (%p1511_p4)  ;;  %303 = vst [vmem:[%s1535_s25] sm:$0xff] (%p1511_p4), %v302_v0  ;;  %305 = vst [vmem:[%s1535_s25 + $0x8] sm:$0xff] (%p1511_p4), %v304_v1 }
  0x16   : > { %v310_v4 = vld [vmem:[%s1527_s24 + $0x40] sm:$0xff] (%p1511_p4)  ;;  %v312_v5 = vld [vmem:[%s1527_s24 + $0x48] sm:$0xff] (%p1511_p4)  ;;  %307 = vst [vmem:[%s1535_s25 + $0x10] sm:$0xff] (%p1511_p4), %v306_v2  ;;  %309 = vst [vmem:[%s1535_s25 + $0x18] sm:$0xff] (%p1511_p4), %v308_v3 }
  0x17   : > { %311 = vst [vmem:[%s1535_s25 + $0x20] sm:$0xff] (%p1511_p4), %v310_v4  ;;  %313 = vst [vmem:[%s1535_s25 + $0x28] sm:$0xff] (%p1511_p4), %v312_v5  ;;  %v314_v6 = vld [vmem:[%s1527_s24 + $0x60] sm:$0xff] (%p1511_p4)  ;;  %v316_v7 = vld [vmem:[%s1527_s24 + $0x68] sm:$0xff] (%p1511_p4) }
  0x18   : > { %v318_v8 = vld [vmem:[%s1527_s24 + $0x80] sm:$0xff]  ;;  %315 = vst [vmem:[%s1535_s25 + $0x30] sm:$0xff] %v314_v6  ;;  %317 = vst [vmem:[%s1535_s25 + $0x38] sm:$0xff] %v316_v7  ;;  %v320_v9 = vld [vmem:[%s1527_s24 + $0x88] sm:$0xff] }
  0x19   : > { %319 = vst [vmem:[%s1535_s25 + $0x40] sm:$0xff] %v318_v8  ;;  %v322_v10 = vld [vmem:[%s1527_s24 + $0xa0] sm:$0xff]  ;;  %v324_v11 = vld [vmem:[%s1527_s24 + $0xa8] sm:$0xff]  ;;  %321 = vst [vmem:[%s1535_s25 + $0x48] sm:$0xff] %v320_v9 }
  0x1a   : > { %323 = vst [vmem:[%s1535_s25 + $0x50] sm:$0xff] %v322_v10  ;;  %325 = vst [vmem:[%s1535_s25 + $0x58] sm:$0xff] %v324_v11  ;;  %v326_v12 = vld [vmem:[%s1527_s24 + $0xc0] sm:$0xff]  ;;  %v328_v13 = vld [vmem:[%s1527_s24 + $0xc8] sm:$0xff] }
  0x1b   : > { %v330_v14 = vld [vmem:[%s1527_s24 + $0xe0] sm:$0xff]  ;;  %327 = vst [vmem:[%s1535_s25 + $0x60] sm:$0xff] %v326_v12  ;;  %329 = vst [vmem:[%s1535_s25 + $0x68] sm:$0xff] %v328_v13  ;;  %v332_v15 = vld [vmem:[%s1527_s24 + $0xe8] sm:$0xff] }
  0x1c   : > { %331 = vst [vmem:[%s1535_s25 + $0x70] sm:$0xff] %v330_v14  ;;  %v334_v16 = vld [vmem:[%s1527_s24 + $0x100] sm:$0xff]  ;;  %v336_v17 = vld [vmem:[%s1527_s24 + $0x108] sm:$0xff]  ;;  %333 = vst [vmem:[%s1535_s25 + $0x78] sm:$0xff] %v332_v15 }
  0x1d   : > { %335 = vst [vmem:[%s1535_s25 + $0x80] sm:$0xff] %v334_v16  ;;  %337 = vst [vmem:[%s1535_s25 + $0x88] sm:$0xff] %v336_v17  ;;  %v338_v18 = vld [vmem:[%s1527_s24 + $0x120] sm:$0xff]  ;;  %v340_v19 = vld [vmem:[%s1527_s24 + $0x128] sm:$0xff] }
  0x1e   : > { %v342_v20 = vld [vmem:[%s1527_s24 + $0x140] sm:$0xff]  ;;  %339 = vst [vmem:[%s1535_s25 + $0x90] sm:$0xff] %v338_v18  ;;  %341 = vst [vmem:[%s1535_s25 + $0x98] sm:$0xff] %v340_v19  ;;  %v344_v21 = vld [vmem:[%s1527_s24 + $0x148] sm:$0xff] }
  0x1f   : > { %343 = vst [vmem:[%s1535_s25 + $0xa0] sm:$0xff] %v342_v20  ;;  %v346_v22 = vld [vmem:[%s1527_s24 + $0x160] sm:$0xff]  ;;  %v348_v23 = vld [vmem:[%s1527_s24 + $0x168] sm:$0xff]  ;;  %345 = vst [vmem:[%s1535_s25 + $0xa8] sm:$0xff] %v344_v21 }
  0x20   : > { %347 = vst [vmem:[%s1535_s25 + $0xb0] sm:$0xff] %v346_v22  ;;  %349 = vst [vmem:[%s1535_s25 + $0xb8] sm:$0xff] %v348_v23  ;;  %v350_v24 = vld [vmem:[%s1527_s24 + $0x180] sm:$0xff]  ;;  %v352_v25 = vld [vmem:[%s1527_s24 + $0x188] sm:$0xff] }
  0x21   : > { %v354_v26 = vld [vmem:[%s1527_s24 + $0x1a0] sm:$0xff]  ;;  %351 = vst [vmem:[%s1535_s25 + $0xc0] sm:$0xff] %v350_v24  ;;  %353 = vst [vmem:[%s1535_s25 + $0xc8] sm:$0xff] %v352_v25  ;;  %v356_v27 = vld [vmem:[%s1527_s24 + $0x1a8] sm:$0xff] }
  0x22   : > { %355 = vst [vmem:[%s1535_s25 + $0xd0] sm:$0xff] %v354_v26  ;;  %v358_v28 = vld [vmem:[%s1527_s24 + $0x1c0] sm:$0xff]  ;;  %v360_v29 = vld [vmem:[%s1527_s24 + $0x1c8] sm:$0xff]  ;;  %357 = vst [vmem:[%s1535_s25 + $0xd8] sm:$0xff] %v356_v27 }
  0x23   : > { %359 = vst [vmem:[%s1535_s25 + $0xe0] sm:$0xff] %v358_v28  ;;  %361 = vst [vmem:[%s1535_s25 + $0xe8] sm:$0xff] %v360_v29  ;;  %v362_v30 = vld [vmem:[%s1527_s24 + $0x1e0] sm:$0xff]  ;;  %v364_v31 = vld [vmem:[%s1527_s24 + $0x1e8] sm:$0xff] }
  0x24   : > { %v366_v32 = vld [vmem:[%s1527_s24 + $0x200] sm:$0xff]  ;;  %363 = vst [vmem:[%s1535_s25 + $0xf0] sm:$0xff] %v362_v30  ;;  %365 = vst [vmem:[%s1535_s25 + $0xf8] sm:$0xff] %v364_v31  ;;  %v368_v33 = vld [vmem:[%s1527_s24 + $0x208] sm:$0xff] }
  0x25   : > { %367 = vst [vmem:[%s1535_s25 + $0x100] sm:$0xff] %v366_v32  ;;  %v370_v34 = vld [vmem:[%s1527_s24 + $0x220] sm:$0xff]  ;;  %v372_v35 = vld [vmem:[%s1527_s24 + $0x228] sm:$0xff]  ;;  %369 = vst [vmem:[%s1535_s25 + $0x108] sm:$0xff] %v368_v33 }
  0x26   : > { %371 = vst [vmem:[%s1535_s25 + $0x110] sm:$0xff] %v370_v34  ;;  %373 = vst [vmem:[%s1535_s25 + $0x118] sm:$0xff] %v372_v35 }
  0x27 PF: > { %379 = sbr.rel (!%p1511_p4) target bundleno = 50 (0x32), region = 71  ;;  %s381_s26 = sand.u32 (%p1511_p4), 1, %s1423_s10  }
  0x28   : > { %s1279_s27 = sshll.u32 (%p1511_p4), %s1427_s11, 4  ;;  %s1342_s28 = smul.u32 (%p1511_p4), 112, %s381_s26 }
  0x29   : > { %s386_s15 = scalar_lea.vmem (%p1511_p4), %s1907_s1, %s1279_s27 }
  0x2a   : > { %v399_v36 = vld [vmem:[%s386_s15] sm:$0xff] (%p1511_p4)  ;;  %v401_v37 = vld [vmem:[%s386_s15 + $0x8] sm:$0xff] (%p1511_p4)  ;;  %s383_s19 = scalar_lea.vmem (%p1511_p4), [#allocation3], %s1342_s28 }
  0x2b   : > { %v403_v38 = vld [vmem:[%s386_s15 + $0x20] sm:$0xff] (%p1511_p4)  ;;  %v405_v39 = vld [vmem:[%s386_s15 + $0x28] sm:$0xff] (%p1511_p4)  ;;  %400 = vst [vmem:[%s383_s19] sm:$0xff] (%p1511_p4), %v399_v36  ;;  %402 = vst [vmem:[%s383_s19 + $0x8] sm:$0xff] (%p1511_p4), %v401_v37 }
  0x2c   : > { %v407_v40 = vld [vmem:[%s386_s15 + $0x40] sm:$0xff] (%p1511_p4)  ;;  %v409_v41 = vld [vmem:[%s386_s15 + $0x48] sm:$0xff] (%p1511_p4)  ;;  %404 = vst [vmem:[%s383_s19 + $0x10] sm:$0xff] (%p1511_p4), %v403_v38  ;;  %406 = vst [vmem:[%s383_s19 + $0x18] sm:$0xff] (%p1511_p4), %v405_v39 }
  0x2d   : > { %408 = vst [vmem:[%s383_s19 + $0x20] sm:$0xff] (%p1511_p4), %v407_v40  ;;  %410 = vst [vmem:[%s383_s19 + $0x28] sm:$0xff] (%p1511_p4), %v409_v41  ;;  %v411_v42 = vld [vmem:[%s386_s15 + $0x60] sm:$0xff] (%p1511_p4)  ;;  %v413_v43 = vld [vmem:[%s386_s15 + $0x68] sm:$0xff] (%p1511_p4) }
  0x2e   : > { %v415_v44 = vld [vmem:[%s386_s15 + $0x80] sm:$0xff]  ;;  %412 = vst [vmem:[%s383_s19 + $0x30] sm:$0xff] %v411_v42  ;;  %414 = vst [vmem:[%s383_s19 + $0x38] sm:$0xff] %v413_v43  ;;  %v417_v45 = vld [vmem:[%s386_s15 + $0x88] sm:$0xff] }
  0x2f   : > { %416 = vst [vmem:[%s383_s19 + $0x40] sm:$0xff] %v415_v44  ;;  %v419_v46 = vld [vmem:[%s386_s15 + $0xa0] sm:$0xff]  ;;  %v421_v47 = vld [vmem:[%s386_s15 + $0xa8] sm:$0xff]  ;;  %418 = vst [vmem:[%s383_s19 + $0x48] sm:$0xff] %v417_v45 }
  0x30   : > { %420 = vst [vmem:[%s383_s19 + $0x50] sm:$0xff] %v419_v46  ;;  %422 = vst [vmem:[%s383_s19 + $0x58] sm:$0xff] %v421_v47  ;;  %v423_v48 = vld [vmem:[%s386_s15 + $0xc0] sm:$0xff]  ;;  %v425_v49 = vld [vmem:[%s386_s15 + $0xc8] sm:$0xff] }
  0x31   : > { %424 = vst [vmem:[%s383_s19 + $0x60] sm:$0xff] %v423_v48  ;;  %426 = vst [vmem:[%s383_s19 + $0x68] sm:$0xff] %v425_v49 }
  0x32 PF: > { %p1263_p7 = scmp.ge.s32.totalorder %s1427_s11, 1  ;;  %p431_p8 = scmp.lt.s32.totalorder %s1427_s11, 3 }
  0x34   : > { %p432_p9 = pnand %p1263_p7, %p431_p8 }
  0x35   : > { %s1613_s17 = sand.u32 (!%p432_p9), 1, %s1419_s30   ;;  %v537_v50 = vld [vmem:[%s1908_s2 + $0x8] sm:$0xff] (!%p432_p9)  ;;  %v1429_v51 = vmov (!%p432_p9), 0.0   ;;  %vm552_vm0 = vcmask (!%p432_p9), 130048   ;;  %v1430_v52 = vmov (!%p432_p9), 0   ;;  %v638_v53 = vld [vmem:[%s1911_s5] sm:$0xff] (!%p432_p9) }
  0x36   : > { %435 = sbr.rel (%p432_p9) target bundleno = 613 (0x265), region = 94  ;;  %721 = vmatprep.mubr.f32.mxu1 (!%p432_p9), %v1429_v51  ;;  %1265 = vmatprep.mubr.msk.f32.mxu0 (!%p432_p9), %vm552_vm0, %v537_v50  ;;  %v540_v54 = vld [vmem:[%s1909_s3] sm:$0xff] (!%p432_p9)  ;;  %v639_v55 = vld [vmem:[%s1911_s5 + $0x8] sm:$0xff] (!%p432_p9)  ;;  %vm650_vm1 = vcmask (!%p432_p9), 457728   ;;  %s1264_s27 = sshll.u32 (!%p432_p9), %s1613_s17, 5 }
  0x37   : > { %s1343_s22 = smul.u32 (!%p432_p9), 288, %s1613_s17  ;;  %1372 = vset.pattern.permute.xlu1 (!%p432_p9), %v1430_v52  ;;  %1371 = vset.pattern.permute.xlu0 (!%p432_p9), %v1430_v52  ;;  %v541_v59 = vld [vmem:[%s1909_s3 + $0x8] sm:$0xff] (!%p432_p9)  ;;  %v1128_v19 = vld [vmem:[%s1914_s8] sm:$0xff] (!%p432_p9)  ;;  %s482_s28 = scalar_lea.vmem (!%p432_p9), [#allocation4], %s1264_s27 }
  0x38   : > { %s1344_s23 = smul.u32 (!%p432_p9), 112, %s1613_s17  ;;  %642 = vperm.xlu1 (!%p432_p9), %1372, %v638_v53   ;;  %544 = vperm.xlu0 (!%p432_p9), %1371, %v540_v54   ;;  %v1129_v5 = vld [vmem:[%s1914_s8 + $0x8] sm:$0xff] (!%p432_p9)  ;;  %v636_v46 = vld [vmem:[%s1910_s4] sm:$0xff] (!%p432_p9) }
  0x39   : > { %s1631_s29 = scalar_lea.vmem (!%p432_p9), [#allocation2], %s1343_s22  ;;  %v637_v54 = vld [vmem:[%s1910_s4 + $0x8] sm:$0xff] (!%p432_p9) }
  0x3a   : > { %v487_v56 = vld [vmem:[%s1631_s29 + $0x8] sm:$0xff] (!%p432_p9)  ;;  %v489_v57 = vld [vmem:[%s1631_s29 + $0x18] sm:$0xff] (!%p432_p9)  ;;  %v486_v58 = vld [vmem:[%s1631_s29] sm:$0xff] (!%p432_p9)  ;;  %s1639_s19 = scalar_lea.vmem (!%p432_p9), [#allocation3], %s1344_s23 }
  0x3b   : > { %v1281_v60 = vpack.c.bf16 (!%p432_p9), %v489_v57, %v487_v56  ;;  %v523_v61 = vld [vmem:[%s1639_s19 + $0x8] sm:$0xff] (!%p432_p9)  ;;  %v525_v62 = vld [vmem:[%s1639_s19 + $0x18] sm:$0xff] (!%p432_p9)  ;;  %v488_v63 = vld [vmem:[%s1631_s29 + $0x10] sm:$0xff] (!%p432_p9) }
  0x3c   : > { %v1317_v0 = vpack.c.bf16 (!%p432_p9), %v525_v62, %v523_v61  ;;  %v1283_v1 = vpack.c.bf16 (!%p432_p9), %v488_v63, %v486_v58  ;;  %v522_v2 = vld [vmem:[%s1639_s19] sm:$0xff] (!%p432_p9)  ;;  %v524_v3 = vld [vmem:[%s1639_s19 + $0x10] sm:$0xff] (!%p432_p9)  ;;  %v491_v4 = vld [vmem:[%s1631_s29 + $0x28] sm:$0xff] (!%p432_p9)  ;;  %647 = vperm.xlu1 (!%p432_p9), %1372, %v639_v55   ;;  %549 = vperm.xlu0 (!%p432_p9), %1371, %v541_v59  }
  0x3d   : > { %1282 = vmatprep.subr.bf16.mxu0 %v1281_v60  ;;  %v1319_v6 = vpack.c.bf16 %v524_v3, %v522_v2  ;;  %v493_v7 = vld [vmem:[%s1631_s29 + $0x38] sm:$0xff]  ;;  %v490_v12 = vld [vmem:[%s1631_s29 + $0x20] sm:$0xff]  ;;  %v492_v13 = vld [vmem:[%s1631_s29 + $0x30] sm:$0xff]  ;;  %s1280_s17 = sshll.u32 (%p1515_p5), %s1255_s12, 4 }
  0x3e   : > { %v527_v8 = vld [vmem:[%s1639_s19 + $0x28] sm:$0xff]  ;;  %v529_v9 = vld [vmem:[%s1639_s19 + $0x38] sm:$0xff]  ;;  %1318 = vmatprep.subr.bf16.mxu1 %v1317_v0  ;;  %1284 = vmatpush1.bf16.msra.mxu0 %v1283_v1  ;;  %v1285_v10 = vpack.c.bf16 %v493_v7, %v491_v4  ;;  %v526_v14 = vld [vmem:[%s1639_s19 + $0x20] sm:$0xff]  ;;  %v1287_v15 = vpack.c.bf16 %v492_v13, %v490_v12 }
  0x3f   : > { %v1321_v11 = vpack.c.bf16 %v529_v9, %v527_v8  ;;  %1320 = vmatpush1.bf16.msra.mxu1 %v1319_v6  ;;  %v528_v16 = vld [vmem:[%s1639_s19 + $0x30] sm:$0xff]  ;;  %v495_v17 = vld [vmem:[%s1631_s29 + $0x48] sm:$0xff]  ;;  %v497_v18 = vld [vmem:[%s1631_s29 + $0x58] sm:$0xff] }
  0x40   : > { %1286 = vmatprep.subr.bf16.mxu0 %v1285_v10  ;;  %v1323_v20 = vpack.c.bf16 %v528_v16, %v526_v14  ;;  %v1289_v21 = vpack.c.bf16 %v497_v18, %v495_v17  ;;  %v531_v22 = vld [vmem:[%s1639_s19 + $0x48] sm:$0xff]  ;;  %v533_v23 = vld [vmem:[%s1639_s19 + $0x58] sm:$0xff]  ;;  %v494_v24 = vld [vmem:[%s1631_s29 + $0x40] sm:$0xff]  ;;  %1137 = vperm.xlu1 %1372, %v1129_v5  }
  0x41   : > { %1322 = vmatprep.subr.bf16.mxu1 %v1321_v11  ;;  %v1325_v25 = vpack.c.bf16 %v533_v23, %v531_v22  ;;  %v496_v26 = vld [vmem:[%s1631_s29 + $0x50] sm:$0xff]  ;;  %v499_v30 = vld [vmem:[%s1631_s29 + $0x68] sm:$0xff]  ;;  %v501_v31 = vld [vmem:[%s1631_s29 + $0x78] sm:$0xff]  ;;  %1132 = vperm.xlu0 %1371, %v1128_v19  }
  0x42   : > { %v530_v27 = vld [vmem:[%s1639_s19 + $0x40] sm:$0xff]  ;;  %v532_v28 = vld [vmem:[%s1639_s19 + $0x50] sm:$0xff]  ;;  %1288 = vmatpush1.bf16.msra.mxu0 %v1287_v15  ;;  %v1291_v29 = vpack.c.bf16 %v496_v26, %v494_v24  ;;  %v1293_v33 = vpack.c.bf16 %v501_v31, %v499_v30  ;;  %v503_v36 = vld [vmem:[%s1631_s29 + $0x88] sm:$0xff] }
  0x43   : > { %1324 = vmatpush1.bf16.msra.mxu1 %v1323_v20  ;;  %1290 = vmatprep.subr.bf16.mxu0 %v1289_v21  ;;  %v1327_v32 = vpack.c.bf16 %v532_v28, %v530_v27  ;;  %v498_v34 = vld [vmem:[%s1631_s29 + $0x60] sm:$0xff]  ;;  %v500_v35 = vld [vmem:[%s1631_s29 + $0x70] sm:$0xff]  ;;  %v505_v37 = vld [vmem:[%s1631_s29 + $0x98] sm:$0xff] }
  0x44   : > { %1326 = vmatprep.subr.bf16.mxu1 %v1325_v25  ;;  %v535_v38 = vld [vmem:[%s1639_s19 + $0x68] sm:$0xff]  ;;  %v1295_v39 = vpack.c.bf16 %v500_v35, %v498_v34  ;;  %v1297_v40 = vpack.c.bf16 %v505_v37, %v503_v36  ;;  %v502_v41 = vld [vmem:[%s1631_s29 + $0x80] sm:$0xff]  ;;  %v504_v42 = vld [vmem:[%s1631_s29 + $0x90] sm:$0xff] }
  0x45   : > { %v534_v43 = vld [vmem:[%s1639_s19 + $0x60] sm:$0xff]  ;;  %v507_v44 = vld [vmem:[%s1631_s29 + $0xa8] sm:$0xff]  ;;  %v509_v45 = vld [vmem:[%s1631_s29 + $0xb8] sm:$0xff]  ;;  %v1299_v47 = vpack.c.bf16 %v504_v42, %v502_v41  ;;  %s1157_s19 = scalar_lea.vmem (%p1515_p5), %s1915_s9, %s1280_s17 }
  0x46   : > { %1292 = vmatpush1.bf16.msra.mxu0 %v1291_v29  ;;  %v1301_v48 = vpack.c.bf16 %v509_v45, %v507_v44  ;;  %v506_v49 = vld [vmem:[%s1631_s29 + $0xa0] sm:$0xff]  ;;  %v508_v50 = vld [vmem:[%s1631_s29 + $0xb0] sm:$0xff]  ;;  %v511_v52 = vld [vmem:[%s1631_s29 + $0xc8] sm:$0xff] }
  0x47   : > { %1328 = vmatpush1.bf16.msra.mxu1 %v1327_v32  ;;  %1294 = vmatprep.subr.bf16.mxu0 %v1293_v33  ;;  %v513_v53 = vld [vmem:[%s1631_s29 + $0xd8] sm:$0xff]  ;;  %v1303_v55 = vpack.c.bf16 %v508_v50, %v506_v49  ;;  %v510_v57 = vld [vmem:[%s1631_s29 + $0xc0] sm:$0xff]  ;;  %v512_v58 = vld [vmem:[%s1631_s29 + $0xd0] sm:$0xff] }
  0x48   : > { %669 = vmatprep.subr.mxu1 %v535_v38  ;;  %v1305_v56 = vpack.c.bf16 %v513_v53, %v511_v52  ;;  %v515_v59 = vld [vmem:[%s1631_s29 + $0xe8] sm:$0xff]  ;;  %v517_v60 = vld [vmem:[%s1631_s29 + $0xf8] sm:$0xff]  ;;  %v1307_v61 = vpack.c.bf16 %v512_v58, %v510_v57  ;;  %v514_v63 = vld [vmem:[%s1631_s29 + $0xe0] sm:$0xff] }
  0x49   : > { %v1309_v62 = vpack.c.bf16 %v517_v60, %v515_v59  ;;  %v516_v0 = vld [vmem:[%s1631_s29 + $0xf0] sm:$0xff]  ;;  %v519_v1 = vld [vmem:[%s1631_s29 + $0x108] sm:$0xff]  ;;  %v521_v2 = vld [vmem:[%s1631_s29 + $0x118] sm:$0xff] }
  0x4a   : > { %1296 = vmatpush1.bf16.msra.mxu0 %v1295_v39  ;;  %v1311_v3 = vpack.c.bf16 %v516_v0, %v514_v63  ;;  %v1313_v4 = vpack.c.bf16 %v521_v2, %v519_v1  ;;  %v518_v5 = vld [vmem:[%s1631_s29 + $0x100] sm:$0xff]  ;;  %v520_v6 = vld [vmem:[%s1631_s29 + $0x110] sm:$0xff]  ;;  %v539_v9 = vld [vmem:[%s1908_s2 + $0x18] sm:$0xff] }
  0x4b   : > { %670 = vmatpush1.msra.mxu1 %v534_v43  ;;  %1298 = vmatprep.subr.bf16.mxu0 %v1297_v40  ;;  %v1315_v7 = vpack.c.bf16 %v520_v6, %v518_v5  ;;  %v536_v8 = vld [vmem:[%s1908_s2] sm:$0xff]  ;;  %v538_v10 = vld [vmem:[%s1908_s2 + $0x10] sm:$0xff] }
  0x4c   : > { %1267 = vmatmul.mubr.msk.f32.vlgmr.msra.gmra.mrb[0].mxu1 %vm650_vm1, %v636_v46 }
  0x4d   : > { %727 = vmatprep.mubr.f32.mxu1 %v1429_v51 }
  0x4e   : > { %1300 = vmatpush1.bf16.msra.mxu0 %v1299_v47 }
  0x4f   : > { %1302 = vmatprep.subr.bf16.mxu0 %v1301_v48 }
  0x50   : > { %1268 = vmatmul.mubr.msk.f32.gmra.mrb[2].mxu1 %vm650_vm1, %v637_v54 }
  0x51   : > { %1032 = vmatprep.mubr.f32.mxu1 %v1429_v51 }
  0x52   : > { %1304 = vmatpush1.bf16.msra.mxu0 %v1303_v55 }
  0x53   : > { %1306 = vmatprep.subr.bf16.mxu0 %v1305_v56 }
  0x56   : > { %1308 = vmatpush1.bf16.msra.mxu0 %v1307_v61 }
  0x57   : > { %1310 = vmatprep.subr.bf16.mxu0 %v1309_v62 }
  0x5a   : > { %1312 = vmatpush1.bf16.msra.mxu0 %v1311_v3 }
  0x5b   : > { %1314 = vmatprep.subr.bf16.mxu0 %v1313_v4 }
  0x5e   : > { %1316 = vmatpush1.bf16.msra.mxu0 %v1315_v7 }
  0x61   : > { %624 = vmatmul.mubr.f32.vlgmr.msra.gmra.mrb[0].mxu0 %v536_v8 }
  0x62   : > { %1266 = vmatprep.mubr.msk.f32.mxu0 %vm552_vm0, %v539_v9 }
  0x65   : > { %630 = vmatmul.mubr.f32.gmra.mrb[2].mxu0 %v538_v10 }
  0xb7   : > { %v643_v11 = vpop.permute.xlu1 %642  ;;  %v545_v42 = vpop.permute.xlu0 %544 }
  0xbb   : > { %v648_v16 = vpop.permute.xlu1 %647  ;;  %v550_v62 = vpop.permute.xlu0 %549 }
 0x11f   : > { %v723_v12 = vpop.f32.mrb[0].mxu1 }
 0x120   : > { %v1714_v13 = vadd.f32 %v723_v12, %v643_v11  ;;  %v725_v14 = vpop.f32.mrb[1].mxu1 }
 0x121   : > { %v1716_v15 = vadd.f32 %v725_v14, %v643_v11 }
 0x122   : > { %v1719_v17 = vmul.f32 0.70710677, %v1714_v13 }
 0x123   : > { %v1722_v18 = vmul.f32 0.70710677, %v1716_v15  ;;  %v729_v19 = vpop.f32.mrb[2].mxu1 }
 0x124   : > { %v742_v20 = vand.u32 2147483647, %v1719_v17  ;;  %v1725_v21 = vadd.f32 %v729_v19, %v648_v16  ;;  %v731_v22 = vpop.f32.mrb[3].mxu1  ;;  %vm822_vm2 = vcmp.lt.f32.partialorder %v1719_v17, 0.0 }
 0x125   : > { %v743_v23 = vand.u32 2147483647, %v1722_v18  ;;  %v1728_v24 = vadd.f32 %v731_v22, %v648_v16  ;;  %vm823_vm3 = vcmp.lt.f32.partialorder %v1722_v18, 0.0 }
 0x126   : > { %v746_v25 = vmul.f32 0.3275911, %v742_v20  ;;  %v1731_v26 = vmul.f32 0.70710677, %v1725_v21  ;;  %v798_v35 = vsub.f32 0.0, %v742_v20 }
 0x127   : > { %v747_v27 = vmul.f32 0.3275911, %v743_v23  ;;  %v1734_v28 = vmul.f32 0.70710677, %v1728_v24  ;;  %v799_v37 = vsub.f32 0.0, %v743_v23 }
 0x128   : > { %v750_v29 = vadd.f32 1.0, %v746_v25  ;;  %v744_v30 = vand.u32 2147483647, %v1731_v26  ;;  %v802_v38 = vmul.f32 %v798_v35, %v742_v20  ;;  %vm824_vm4 = vcmp.lt.f32.partialorder %v1731_v26, 0.0 }
 0x129   : > { %v751_v31 = vadd.f32 1.0, %v747_v27  ;;  %v745_v33 = vand.u32 2147483647, %v1734_v28  ;;  %v803_v41 = vmul.f32 %v799_v37, %v743_v23  ;;  %vm825_vm5 = vcmp.lt.f32.partialorder %v1734_v28, 0.0 }
 0x12a   : > { %1373 = vrcp.f32 %v750_v29  ;;  %v748_v32 = vmul.f32 0.3275911, %v744_v30  ;;  %v800_v39 = vsub.f32 0.0, %v744_v30  ;;  %v806_v46 = vmul.f32 1.442695, %v802_v38 }
 0x12b   : > { %1375 = vrcp.f32 %v751_v31  ;;  %v749_v36 = vmul.f32 0.3275911, %v745_v33  ;;  %v808_v54 = vmul.f32 1.442695, %v803_v41  ;;  %v801_v10 = vsub.f32 0.0, %v745_v33 }
 0x12c   : > { %v752_v34 = vadd.f32 1.0, %v748_v32  ;;  %v804_v47 = vmul.f32 %v800_v39, %v744_v30  ;;  %v1783_v41 = vmul.f32 0.5, %v1716_v15 }
 0x12d   : > { %v753_v40 = vadd.f32 1.0, %v749_v36  ;;  %v805_v32 = vmul.f32 %v801_v10, %v745_v33  ;;  %v1778_v36 = vmul.f32 0.5, %v1714_v13 }
 0x12e   : > { %1377 = vrcp.f32 %v752_v34  ;;  %v810_v61 = vmul.f32 1.442695, %v804_v47 }
 0x12f   : > { %1379 = vrcp.f32 %v753_v40 }
 0x130   : > { %1381 = vpow2.f32 %v806_v46 }
 0x131   : > { %1383 = vpow2.f32 %v808_v54  ;;  %v812_v54 = vmul.f32 1.442695, %v805_v32 }
 0x132   : > { %1385 = vpow2.f32 %v810_v61 }
 0x134   : > { %v1738_v43 = vpop.eup %1373  ;;  %v625_v44 = vpop.f32.mrb[0].mxu0 }
 0x135   : > { %v1740_v45 = vpop.eup %1375  ;;  %v1742_v48 = vadd.f32 %v625_v44, %v545_v42  ;;  %v762_v49 = vmul.f32 1.0614054, %v1738_v43  ;;  %v627_v50 = vpop.f32.mrb[1].mxu0 }
 0x136   : > { %v1745_v52 = vadd.f32 %v627_v50, %v545_v42  ;;  %v763_v53 = vmul.f32 1.0614054, %v1740_v45 }
 0x137   : > { %v766_v55 = vadd.f32 -1.4531521, %v762_v49  ;;  %v1749_v56 = vmul.f32 0.70710677, %v1742_v48 }
 0x138   : > { %v1751_v57 = vpop.eup %1377  ;;  %v767_v58 = vadd.f32 -1.4531521, %v763_v53  ;;  %v1754_v59 = vmul.f32 0.70710677, %v1745_v52  ;;  %v631_v60 = vpop.f32.mrb[2].mxu0 }
 0x139   : > { %v770_v63 = vmul.f32 %v1738_v43, %v766_v55  ;;  %v854_v0 = vand.u32 2147483647, %v1749_v56  ;;  %v633_v1 = vpop.f32.mrb[3].mxu0  ;;  %v1760_v4 = vadd.f32 %v631_v60, %v550_v62  ;;  %v764_v5 = vmul.f32 1.0614054, %v1751_v57  ;;  %v1769_v27 = vpop.eup %1379 }
 0x13a   : > { %v771_v2 = vmul.f32 %v1740_v45, %v767_v58  ;;  %v855_v3 = vand.u32 2147483647, %v1754_v59  ;;  %v1774_v31 = vadd.f32 %v633_v1, %v550_v62  ;;  %v1382_v40 = vpop.eup %1381  ;;  %v765_v33 = vmul.f32 1.0614054, %v1769_v27 }
 0x13b   : > { %v774_v6 = vadd.f32 1.4214138, %v770_v63  ;;  %v858_v7 = vmul.f32 0.3275911, %v854_v0  ;;  %v768_v14 = vadd.f32 -1.4531521, %v764_v5  ;;  %v1384_v53 = vpop.eup %1383 }
 0x13c   : > { %v775_v8 = vadd.f32 1.4214138, %v771_v2  ;;  %v859_v9 = vmul.f32 0.3275911, %v855_v3  ;;  %v1766_v20 = vmul.f32 0.70710677, %v1760_v4  ;;  %v1386_v5 = vpop.eup %1385 }
 0x13d   : > { %v778_v11 = vmul.f32 %v1738_v43, %v774_v6  ;;  %v862_v12 = vadd.f32 1.0, %v858_v7  ;;  %v910_v23 = vsub.f32 0.0, %v854_v0  ;;  %v772_v25 = vmul.f32 %v1751_v57, %v768_v14 }
 0x13e   : > { %v779_v16 = vmul.f32 %v1740_v45, %v775_v8  ;;  %v863_v19 = vadd.f32 1.0, %v859_v9  ;;  %v1772_v30 = vand.u32 2147483647, %v1766_v20  ;;  %v911_v38 = vsub.f32 0.0, %v855_v3 }
 0x13f   : > { %v782_v22 = vadd.f32 -0.28449672, %v778_v11  ;;  %1387 = vrcp.f32 %v862_v12  ;;  %v776_v35 = vadd.f32 1.4214138, %v772_v25  ;;  %v914_v46 = vmul.f32 %v910_v23, %v854_v0 }
 0x140   : > { %v783_v29 = vadd.f32 -0.28449672, %v779_v16  ;;  %1389 = vrcp.f32 %v863_v19  ;;  %v860_v39 = vmul.f32 0.3275911, %v1772_v30  ;;  %v1789_v50 = vmul.f32 0.70710677, %v1774_v31 }
 0x141   : > { %v786_v34 = vmul.f32 %v1738_v43, %v782_v22  ;;  %v780_v44 = vmul.f32 %v1751_v57, %v776_v35  ;;  %v769_v60 = vadd.f32 -1.4531521, %v765_v33  ;;  %v915_v62 = vmul.f32 %v911_v38, %v855_v3 }
 0x142   : > { %v787_v37 = vmul.f32 %v1740_v45, %v783_v29  ;;  %v864_v49 = vadd.f32 1.0, %v860_v39  ;;  %v1794_v63 = vand.u32 2147483647, %v1789_v50  ;;  %v736_v6 = vmul.f32 0.5, %v1725_v21 }
 0x143   : > { %v790_v42 = vadd.f32 0.2548296, %v786_v34  ;;  %v784_v58 = vadd.f32 -0.28449672, %v780_v44  ;;  %v773_v2 = vmul.f32 %v1769_v27, %v769_v60  ;;  %v920_v16 = vmul.f32 1.442695, %v915_v62 }
 0x144   : > { %v791_v47 = vadd.f32 0.2548296, %v787_v37  ;;  %1391 = vrcp.f32 %v864_v49  ;;  %v861_v8 = vmul.f32 0.3275911, %v1794_v63  ;;  %v912_v35 = vsub.f32 0.0, %v1772_v30 }
 0x145   : > { %v794_v55 = vmul.f32 %v1738_v43, %v790_v42  ;;  %v788_v1 = vmul.f32 %v1751_v57, %v784_v58  ;;  %v918_v43 = vmul.f32 1.442695, %v914_v46  ;;  %1393 = vpow2.f32 %v812_v54 }
 0x146   : > { %v795_v61 = vmul.f32 %v1740_v45, %v791_v47  ;;  %v777_v10 = vadd.f32 1.4214138, %v773_v2  ;;  %v865_v19 = vadd.f32 1.0, %v861_v8  ;;  %v913_v2 = vsub.f32 0.0, %v1794_v63 }
 0x147   : > { %v814_v0 = vmul.f32 %v1382_v40, %v794_v55  ;;  %v792_v9 = vadd.f32 0.2548296, %v788_v1  ;;  %v916_v55 = vmul.f32 %v912_v35, %v1772_v30  ;;  %vm934_vm6 = vcmp.lt.f32.partialorder %v1749_v56, 0.0 }
 0x148   : > { %v815_v7 = vmul.f32 %v1384_v53, %v795_v61  ;;  %v781_v29 = vmul.f32 %v1769_v27, %v777_v10  ;;  %1395 = vrcp.f32 %v865_v19  ;;  %vm935_vm7 = vcmp.lt.f32.partialorder %v1754_v59, 0.0 }
 0x149   : > { %v1801_v45 = vpop.eup %1387  ;;  %v818_v3 = vsub.f32 1.0, %v814_v0  ;;  %v796_v25 = vmul.f32 %v1751_v57, %v792_v9  ;;  %1397 = vpow2.f32 %v918_v43  ;;  %vm936_vm8 = vcmp.lt.f32.partialorder %v1766_v20, 0.0 }
 0x14a   : > { %v1803_v11 = vpop.eup %1389  ;;  %v874_v12 = vmul.f32 1.0614054, %v1801_v45  ;;  %v819_v14 = vsub.f32 1.0, %v815_v7  ;;  %v785_v40 = vadd.f32 -0.28449672, %v781_v29  ;;  %1399 = vpow2.f32 %v920_v16 }
 0x14b   : > { %v826_v22 = vsub.f32 0.0, %v818_v3  ;;  %v875_v23 = vmul.f32 1.0614054, %v1803_v11  ;;  %v816_v39 = vmul.f32 %v1386_v5, %v796_v25  ;;  %vm937_vm9 = vcmp.lt.f32.partialorder %v1789_v50, 0.0  ;;  %v1133_v50 = vpop.permute.xlu0 %1132 }
 0x14c   : > { %v878_v32 = vadd.f32 -1.4531521, %v874_v12  ;;  %v827_v34 = vsub.f32 0.0, %v819_v14  ;;  %v789_v49 = vmul.f32 %v1769_v27, %v785_v40 }
 0x14d   : > { %v830_v37 = vsel %vm822_vm2, %v826_v22, %v818_v3  ;;  %v879_v38 = vadd.f32 -1.4531521, %v875_v23  ;;  %v820_v47 = vsub.f32 1.0, %v816_v39  ;;  %v922_v3 = vmul.f32 1.442695, %v916_v55 }
 0x14e   : > { %v834_v42 = vadd.f32 1.0, %v830_v37  ;;  %v882_v44 = vmul.f32 %v1801_v45, %v878_v32  ;;  %v831_v57 = vsel %vm823_vm3, %v827_v34, %v819_v14  ;;  %v1818_v53 = vpop.eup %1391  ;;  %v793_v1 = vadd.f32 0.2548296, %v789_v49 }
 0x14f   : > { %v835_v33 = vadd.f32 1.0, %v831_v57  ;;  %v883_v46 = vmul.f32 %v1803_v11, %v879_v38  ;;  %v828_v61 = vsub.f32 0.0, %v820_v47  ;;  %v876_v18 = vmul.f32 1.0614054, %v1818_v53  ;;  %v1394_v5 = vpop.eup %1393 }
 0x150   : > { %v838_v17 = vmul.f32 %v834_v42, %v1778_v36  ;;  %v886_v54 = vadd.f32 1.4214138, %v882_v44  ;;  %v797_v9 = vmul.f32 %v1769_v27, %v793_v1  ;;  %v917_v23 = vmul.f32 %v913_v2, %v1794_v63 }
 0x151   : > { %v839_v58 = vmul.f32 %v835_v33, %v1783_v41  ;;  %v887_v60 = vadd.f32 1.4214138, %v883_v46  ;;  %v832_v41 = vsel %vm824_vm4, %v828_v61, %v820_v47  ;;  %v880_v43 = vadd.f32 -1.4531521, %v876_v18 }
 0x152   : > { %v1825_v62 = vmul.f32 %v838_v17, %v1742_v48  ;;  %v890_v0 = vmul.f32 %v1801_v45, %v886_v54  ;;  %v836_v8 = vadd.f32 1.0, %v832_v41  ;;  %v1396_v14 = vpop.eup %1395  ;;  %v817_v22 = vmul.f32 %v1394_v5, %v797_v9 }
 0x153   : > { %v1830_v36 = vmul.f32 %v839_v58, %v1745_v52  ;;  %v891_v30 = vmul.f32 %v1803_v11, %v887_v60  ;;  %v884_v12 = vmul.f32 %v1818_v53, %v880_v43  ;;  %v877_v29 = vmul.f32 1.0614054, %v1396_v14  ;;  %v1398_v32 = vpop.eup %1397 }
 0x154   : > { %v894_v7 = vadd.f32 -0.28449672, %v890_v0  ;;  %v840_v19 = vmul.f32 %v836_v8, %v736_v6  ;;  %1401 = vpow2.f32 %v922_v3  ;;  %v821_v27 = vsub.f32 1.0, %v817_v22  ;;  %v1400_v40 = vpop.eup %1399 }
 0x155   : > { %v895_v10 = vadd.f32 -0.28449672, %v891_v30  ;;  %v888_v26 = vadd.f32 1.4214138, %v884_v12  ;;  %v881_v39 = vadd.f32 -1.4531521, %v877_v29 }
 0x156   : > { %v898_v16 = vmul.f32 %v1801_v45, %v894_v7  ;;  %v1841_v35 = vmul.f32 %v840_v19, %v1760_v4  ;;  %v829_v42 = vsub.f32 0.0, %v821_v27  ;;  %v924_v44 = vmul.f32 1.442695, %v917_v23 }
 0x157   : > { %v899_v25 = vmul.f32 %v1803_v11, %v895_v10  ;;  %v892_v38 = vmul.f32 %v1818_v53, %v888_v26  ;;  %v885_v46 = vmul.f32 %v1396_v14, %v881_v39  ;;  %v737_v47 = vmul.f32 0.5, %v1728_v24 }
 0x158   : > { %v902_v34 = vadd.f32 0.2548296, %v898_v16  ;;  %v1335_v63 = vpack.c.bf16 %v1841_v35, %v1825_v62  ;;  %v833_v17 = vsel %vm825_vm5, %v829_v42, %v821_v27  ;;  %1403 = vpow2.f32 %v924_v44 }
 0x159   : > { %v903_v37 = vadd.f32 0.2548296, %v899_v25  ;;  %v896_v33 = vadd.f32 -0.28449672, %v892_v38  ;;  %v837_v58 = vadd.f32 1.0, %v833_v17  ;;  %v846_v43 = vmul.f32 0.5, %v1742_v48 }
 0x15a   : > { %v906_v6 = vmul.f32 %v1801_v45, %v902_v34  ;;  %v889_v45 = vadd.f32 1.4214138, %v885_v46  ;;  %v847_v12 = vmul.f32 0.5, %v1745_v52  ;;  %v848_v52 = vmul.f32 0.5, %v1760_v4  ;;  %v960_v4 = vld [vmem:[%s1913_s7] sm:$0xff] }
 0x15b   : > { %v907_v57 = vmul.f32 %v1803_v11, %v903_v37  ;;  %v900_v55 = vmul.f32 %v1818_v53, %v896_v33  ;;  %v841_v0 = vmul.f32 %v837_v58, %v737_v47 }
 0x15c   : > { %v926_v49 = vmul.f32 %v1398_v32, %v906_v6  ;;  %v893_v1 = vmul.f32 %v1396_v14, %v889_v45 }
 0x15d   : > { %v927_v54 = vmul.f32 %v1400_v40, %v907_v57  ;;  %v904_v18 = vadd.f32 0.2548296, %v900_v55  ;;  %v845_v5 = vmul.f32 %v841_v0, %v1774_v31  ;;  %v1138_v57 = vpop.permute.xlu1 %1137 }
 0x15e   : > { %v930_v60 = vsub.f32 1.0, %v926_v49  ;;  %v897_v30 = vadd.f32 -0.28449672, %v893_v1  ;;  %v1402_v41 = vpop.eup %1401 }
 0x15f   : > { %v931_v61 = vsub.f32 1.0, %v927_v54  ;;  %v908_v2 = vmul.f32 %v1818_v53, %v904_v18  ;;  %v1333_v16 = vpack.c.bf16 %v845_v5, %v1830_v36 }
 0x160   : > { %v938_v28 = vsub.f32 0.0, %v930_v60  ;;  %v901_v10 = vmul.f32 %v1396_v14, %v897_v30 }
 0x161   : > { %v939_v11 = vsub.f32 0.0, %v931_v61  ;;  %v928_v9 = vmul.f32 %v1402_v41, %v908_v2 }
 0x162   : > { %v942_v7 = vsel %vm934_vm6, %v938_v28, %v930_v60  ;;  %v905_v22 = vadd.f32 0.2548296, %v901_v10  ;;  %v1404_v29 = vpop.eup %1403 }
 0x163   : > { %v946_v8 = vadd.f32 1.0, %v942_v7  ;;  %v943_v3 = vsel %vm935_vm7, %v939_v11, %v931_v61  ;;  %v932_v53 = vsub.f32 1.0, %v928_v9 }
 0x164   : > { %v947_v56 = vadd.f32 1.0, %v943_v3  ;;  %v909_v48 = vmul.f32 %v1396_v14, %v905_v22  ;;  %v849_v14 = vmul.f32 0.5, %v1774_v31  ;;  %v959_v31 = vld [vmem:[%s1912_s6 + $0x8] sm:$0xff] }
 0x165   : > { %v950_v19 = vmul.f32 %v946_v8, %v846_v43  ;;  %v940_v26 = vsub.f32 0.0, %v932_v53 }
 0x166   : > { %v951_v23 = vmul.f32 %v947_v56, %v847_v12  ;;  %v929_v34 = vmul.f32 %v1404_v29, %v909_v48 }
 0x167   : > { %v954_v25 = vmul.f32 %v950_v19, %v1714_v13  ;;  %v944_v32 = vsel %vm936_vm8, %v940_v26, %v932_v53 }
 0x168   : > { %v955_v59 = vmul.f32 %v951_v23, %v1716_v15  ;;  %v948_v27 = vadd.f32 1.0, %v944_v32  ;;  %v933_v37 = vsub.f32 1.0, %v929_v34 }
 0x16a   : > { %v952_v36 = vmul.f32 %v948_v27, %v848_v52  ;;  %v941_v38 = vsub.f32 0.0, %v933_v37 }
 0x16c   : > { %v956_v39 = vmul.f32 %v952_v36, %v1725_v21  ;;  %v945_v13 = vsel %vm937_vm9, %v941_v38, %v933_v37  ;;  %v961_v21 = vld [vmem:[%s1913_s7 + $0x8] sm:$0xff] }
 0x16d   : > { %v949_v40 = vadd.f32 1.0, %v945_v13 }
 0x16e   : > { %v1331_v6 = vpack.c.bf16 %v956_v39, %v954_v25 }
 0x16f   : > { %v953_v20 = vmul.f32 %v949_v40, %v849_v14 }
 0x171   : > { %v957_v15 = vmul.f32 %v953_v20, %v1728_v24  ;;  %v958_v24 = vld [vmem:[%s1912_s6] sm:$0xff] }
 0x173   : > { %v1329_v42 = vpack.c.bf16 %v957_v15, %v955_v59 }
 0x175   : > { %1330 = vmatprep.subr.bf16.mxu1 %v1329_v42 }
 0x176   : > { %1332 = vmatpush1.bf16.msra.mxu1 %v1331_v6 }
 0x177   : > { %1334 = vmatprep.subr.bf16.mxu1 %v1333_v16 }
 0x179   : > { %1269 = vmatmul.mubr.msk.f32.vlgmr.msra.gmra.mrb[4].mxu1 %vm552_vm0, %v960_v4 }
 0x17a   : > { %1336 = vmatpush1.bf16.msra.mxu1 %v1335_v63  ;;  %1038 = vmatprep.mubr.f32.mxu1 %v1429_v51 }
 0x17d   : > { %1270 = vmatmul.mubr.msk.f32.gmra.mrb[6].mxu1 %vm552_vm0, %v961_v21 }
 0x17e   : > { %1115 = vmatprep.mubr.f32.mxu1 %v1429_v51 }
 0x181   : > { %1271 = vmatmul.mubr.msk.f32.vlgmr.msra.gmra.mrb[4].mxu1 %vm552_vm0, %v958_v24 }
 0x182   : > { %1121 = vmatprep.mubr.f32.mxu1 %v1429_v51 }
 0x185   : > { %1272 = vmatmul.mubr.msk.f32.gmra.mrb[6].mxu1 %vm552_vm0, %v959_v31 }
 0x254   : > { %v1117_v62 = vpop.f32.mrb[4].mxu1 }
 0x255   : > { %v1140_v35 = vadd.f32 %v1133_v50, %v1117_v62  ;;  %v1119_v63 = vpop.f32.mrb[5].mxu1 }
 0x256   : > { %v1141_v44 = vadd.f32 %v1133_v50, %v1119_v63  ;;  %1154 = sbr.rel (!%p1515_p5) target bundleno = 613 (0x265), region = 106 }
 0x257   : > { %1144 = vst [vmem:[%s482_s28] sm:$0xff] %v1140_v35 }
 0x258   : > { %1145 = vst [vmem:[%s482_s28 + $0x8] sm:$0xff] %v1141_v44  ;;  %v1123_v33 = vpop.f32.mrb[6].mxu1 }
 0x259   : > { %v1142_v46 = vadd.f32 %v1138_v57, %v1123_v33  ;;  %v1125_v47 = vpop.f32.mrb[7].mxu1 }
 0x25a   : > { %v1143_v51 = vadd.f32 %v1138_v57, %v1125_v47 }
 0x25b   : > { %1146 = vst [vmem:[%s482_s28 + $0x10] sm:$0xff] %v1142_v46 }
 0x25c   : > { %1147 = vst [vmem:[%s482_s28 + $0x18] sm:$0xff] %v1143_v51 }
 0x25e   : > { %v1170_v49 = vld [vmem:[%s482_s28] sm:$0xff] }
 0x25f   : > { %v1172_v17 = vld [vmem:[%s482_s28 + $0x8] sm:$0xff]  ;;  %1171 = vst [vmem:[%s1157_s19] sm:$0xff] %v1170_v49 }
 0x260   : > { %1173 = vst [vmem:[%s1157_s19 + $0x8] sm:$0xff] %v1172_v17 }
 0x262   : > { %v1174_v54 = vld [vmem:[%s482_s28 + $0x10] sm:$0xff] }
 0x263   : > { %v1176_v55 = vld [vmem:[%s482_s28 + $0x18] sm:$0xff]  ;;  %1175 = vst [vmem:[%s1157_s19 + $0x20] sm:$0xff] %v1174_v54 }
 0x264   : > { %1177 = vst [vmem:[%s1157_s19 + $0x28] sm:$0xff] %v1176_v55 }
 0x265 PF: > { %p16_p10 = scmp.ge.s32.totalorder %s1498_s13, 4   ;;  %s1918_s30 = smov %s1423_s10 }
 0x266   : > { %s1919_s10 = smov %s1509_s16  ;;  %s1920_s11 = smov %s1498_s13 }
 0x267   :  { %18 = sbr.rel (!%p16_p10) target bundleno = 2 (0x2), region = 168 }

</bundles_post_ra>
